<compile_context>
chip_gen: v7x
topology: tpu7x:2x2x1
jax: 0.10.0
libtpu: 0.0.40
codegen_flags: <defaults>
</compile_context>

<pallas_src>
import jax
import jax.numpy as jnp
from jax.experimental import pallas as pl
from jax.experimental.pallas import tpu as pltpu

_LANES = 128
_EPS = 1e-12  # F.normalize default eps


def _avsim_kernel(v_ref, a_ref, o_ref):
    # v_ref, a_ref: (bt, 128, D) VMEM tiles; o_ref: (bt, 128) lane-dense output.
    v = v_ref[...].astype(jnp.float32)
    a = a_ref[...].astype(jnp.float32)

    # Three lane-axis reductions; do NOT materialize normalized tensors.
    dot = jnp.sum(v * a, axis=-1)
    vv = jnp.sum(v * v, axis=-1)
    aa = jnp.sum(a * a, axis=-1)

    eps2 = jnp.float32(_EPS * _EPS)
    inv_v = jax.lax.rsqrt(jnp.maximum(vv, eps2))  # EUP op, otherwise-idle slot
    inv_a = jax.lax.rsqrt(jnp.maximum(aa, eps2))
    o_ref[...] = (dot * inv_v * inv_a).astype(o_ref.dtype)


def _choose_block_groups(nb, d, itemsize, *, target_bytes=2 << 20, min_grid=4):
    """How many 128-row groups go in one block.

    ~2 MiB per input block => 2 inputs x 2 buffers ~= 8 MiB, fits default
    scoped VMEM on v5e/v6e/v7x. Keep >= min_grid grid steps (when the data is
    big enough) so the parallel grid axis can shard across v7x's 2 TCs.
    """
    bytes_per_group = _LANES * d * itemsize
    bt = max(1, min(target_bytes // bytes_per_group, pl.cdiv(nb, min_grid)))
    if bt < nb:
        # Blocked case: keep the output block's sublane dim a multiple of 16
        # (safe for both f32 (8,128) and bf16 (16,128) tiling).
        bt = max(16, (bt // 16) * 16)
    return min(bt, nb)


@jax.jit
def av_similarity(v_fea, a_fea):
    assert v_fea.shape == a_fea.shape
    *lead, d = v_fea.shape
    n = 1
    for s in lead:
        n *= s
    out_dtype = v_fea.dtype  # match PyTorch: output dtype follows input dtype

    v2 = v_fea.reshape(n, d)
    a2 = a_fea.reshape(n, d)

    itemsize = jnp.dtype(v_fea.dtype).itemsize
    nb = pl.cdiv(n, _LANES)                 # number of 128-row groups
    bt = _choose_block_groups(nb, d, itemsize)
    nb_pad = pl.cdiv(nb, bt) * bt
    n_pad = nb_pad * _LANES

    if n_pad != n:
        pad = ((0, n_pad - n), (0, 0))
        v2 = jnp.pad(v2, pad)               # padded rows -> cos = 0, sliced off
        a2 = jnp.pad(a2, pad)

    # Free row-major reshape: rows grouped into lane-width chunks so the output
    # block (bt, 128) is lane-dense instead of a (tile, 1) masked-store column.
    v3 = v2.reshape(nb_pad, _LANES, d)
    a3 = a2.reshape(nb_pad, _LANES, d)

    grid = (nb_pad // bt,)

    out = pl.pallas_call(
        _avsim_kernel,
        out_shape=jax.ShapeDtypeStruct((nb_pad, _LANES), out_dtype),
        grid_spec=pltpu.PrefetchScalarGridSpec(
            num_scalar_prefetch=0,
            grid=grid,
            in_specs=[
                pl.BlockSpec((bt, _LANES, d), lambda i: (i, 0, 0)),
                pl.BlockSpec((bt, _LANES, d), lambda i: (i, 0, 0)),
            ],
            out_specs=pl.BlockSpec((bt, _LANES), lambda i: (i, 0)),
        ),
        compiler_params=pltpu.CompilerParams(
            dimension_semantics=("parallel",),
        ),
    )(v3, a3)

    # TODO(synk): for very small D (<128) a fully transposed (D on sublanes,
    # rows on lanes) layout would also fill input-vreg lanes; skipped to avoid
    # the extra HBM transpose pass in the wrapper.
    return out.reshape(n_pad)[:n].reshape(tuple(lead))


def _reference(v_fea, a_fea):
    eps = 1e-12
    vn = jnp.maximum(jnp.linalg.norm(v_fea, axis=-1, keepdims=True), eps)
    an = jnp.maximum(jnp.linalg.norm(a_fea, axis=-1, keepdims=True), eps)
    return jnp.sum((v_fea / vn) * (a_fea / an), axis=-1)


if __name__ == "__main__":
    key = jax.random.PRNGKey(0)
    k1, k2 = jax.random.split(key)

    B, T, D = 2, 8, 32  # small shapes consistent with [batch, seq, hidden]
    v_fea = jax.random.normal(k1, (B, T, D), dtype=jnp.float32)
    a_fea = jax.random.normal(k2, (B, T, D), dtype=jnp.float32)

    cos = jax.block_until_ready(av_similarity(v_fea, a_fea))

    ref = _reference(v_fea, a_fea)
    assert cos.shape == (B, T)
    assert jnp.allclose(cos, ref, atol=1e-5, rtol=1e-5)

    print("KERNEL_OK")
</pallas_src>

<mosaic_0001>
module attributes {stable_mosaic.version = 11 : i64} {
  func.func @_avsim_kernel(%arg0: i32, %arg1: memref<1x128x32xf32, #tpu.memory_space<vmem>>, %arg2: memref<1x128x32xf32, #tpu.memory_space<vmem>>, %arg3: memref<1x128xf32, #tpu.memory_space<vmem>>) attributes {dimension_semantics = [#tpu.dimension_semantics<parallel>], iteration_bounds = array<i64: 1>, scalar_prefetch = 0 : i64, scratch_operands = 0 : i64, tpu.core_type = #tpu.core_type<tc>, window_params = [{transform_indices = @transform_0, window_bounds = array<i64: 1, 128, 32>}, {transform_indices = @transform_1, window_bounds = array<i64: 1, 128, 32>}, {transform_indices = @transform_2, window_bounds = array<i64: 1, 128>}]} {
    %c0 = arith.constant 0 : index
    %c0_0 = arith.constant 0 : index
    %c0_1 = arith.constant 0 : index
    %0 = vector.load %arg1[%c0, %c0_0, %c0_1] : memref<1x128x32xf32, #tpu.memory_space<vmem>>, vector<1x128x32xf32>
    %c0_2 = arith.constant 0 : index
    %c0_3 = arith.constant 0 : index
    %c0_4 = arith.constant 0 : index
    %1 = vector.load %arg2[%c0_2, %c0_3, %c0_4] : memref<1x128x32xf32, #tpu.memory_space<vmem>>, vector<1x128x32xf32>
    %2 = arith.mulf %0, %1 : vector<1x128x32xf32>
    %cst = arith.constant dense<0.000000e+00> : vector<1x128xf32>
    %3 = vector.multi_reduction <add>, %2, %cst [2] : vector<1x128x32xf32> to vector<1x128xf32>
    %4 = arith.mulf %0, %0 : vector<1x128x32xf32>
    %cst_5 = arith.constant dense<0.000000e+00> : vector<1x128xf32>
    %5 = vector.multi_reduction <add>, %4, %cst_5 [2] : vector<1x128x32xf32> to vector<1x128xf32>
    %6 = arith.mulf %1, %1 : vector<1x128x32xf32>
    %cst_6 = arith.constant dense<0.000000e+00> : vector<1x128xf32>
    %7 = vector.multi_reduction <add>, %6, %cst_6 [2] : vector<1x128x32xf32> to vector<1x128xf32>
    %cst_7 = arith.constant 1.000000e-24 : f32
    %8 = vector.broadcast %cst_7 : f32 to vector<1x128xf32>
    %9 = arith.maximumf %5, %8 : vector<1x128xf32>
    %10 = math.rsqrt %9 : vector<1x128xf32>
    %cst_8 = arith.constant 1.000000e-24 : f32
    %11 = vector.broadcast %cst_8 : f32 to vector<1x128xf32>
    %12 = arith.maximumf %7, %11 : vector<1x128xf32>
    %13 = math.rsqrt %12 : vector<1x128xf32>
    %14 = arith.mulf %3, %10 : vector<1x128xf32>
    %15 = arith.mulf %14, %13 : vector<1x128xf32>
    %c0_9 = arith.constant 0 : index
    %c0_10 = arith.constant 0 : index
    %16 = vector.load %arg3[%c0_9, %c0_10] : memref<1x128xf32, #tpu.memory_space<vmem>>, vector<1x128xf32>
    tpu.vector_store %arg3[%c0_9, %c0_10], %15 {strides = array<i32>} : memref<1x128xf32, #tpu.memory_space<vmem>>, vector<1x128xf32>,
    return
  }
  func.func @transform_0(%arg0: i32) -> (i32, i32, i32) {
    %c0_i32 = arith.constant 0 : i32
    %c0_i32_0 = arith.constant 0 : i32
    %c0_i32_1 = arith.constant 0 : i32
    return %arg0, %c0_i32, %c0_i32_0 : i32, i32, i32
  }
  func.func @transform_1(%arg0: i32) -> (i32, i32, i32) {
    %c0_i32 = arith.constant 0 : i32
    %c0_i32_0 = arith.constant 0 : i32
    %c0_i32_1 = arith.constant 0 : i32
    return %arg0, %c0_i32, %c0_i32_0 : i32, i32, i32
  }
  func.func @transform_2(%arg0: i32) -> (i32, i32) {
    %c0_i32 = arith.constant 0 : i32
    %c0_i32_0 = arith.constant 0 : i32
    return %arg0, %c0_i32 : i32, i32
  }
}

</mosaic_0001>

<bundles_post_ra>
// kernel: av_similarity.1
= control target key start
LH: loop header
LB: loop body
LE: loop exit
PB: predicated region body
PF: predicated region fallthrough
CT: control target
= control target key end

     0   :  { %vm59_vm0 = vcmask 261120   ;;  %vm359_vm1 = vcmask 130112   ;;  %vm366_vm2 = vcmask 195712   ;;  %vm373_vm3 = vcmask 261312   ;;  %s952_s0 = inlined_call_operand.vmem [shape: f32[1,128,32], index: 0, kind: input, shape index: {}]   ;;  %s953_s1 = inlined_call_operand.vmem [shape: f32[1,128,32], index: 1, kind: input, shape index: {}]   ;;  %s954_s2 = inlined_call_operand.vmem [shape: f32[1,128], index: 2, kind: output, shape index: {}]  }
   0x1   :  { %v547_v0 = vld [vmem:[%s952_s0 + $0x10] sm:$0xff]  ;;  %v552_v1 = vld [vmem:[%s952_s0] sm:$0xff]  ;;  %v557_v2 = vld [vmem:[%s952_s0 + $0x18] sm:$0xff]  ;;  %vm380_vm4 = vcmask 326912   ;;  %vm387_vm5 = vcmask 392512   ;;  %vm394_vm6 = vcmask 458112  }
   0x2   :  { %v110_v3 = vmul.f32 %v547_v0, %v547_v0  ;;  %v108_v4 = vmul.f32 %v552_v1, %v552_v1  ;;  %v111_v5 = vmul.f32 %v557_v2, %v557_v2  ;;  %v568_v6 = vld [vmem:[%s952_s0 + $0x8] sm:$0xff]  ;;  %v580_v9 = vld [vmem:[%s953_s1] sm:$0xff]  ;;  %v593_v16 = vld [vmem:[%s953_s1 + $0x10] sm:$0xff]  ;;  %vm401_vm7 = vcmask 523712  }
   0x3   :  { %v109_v7 = vmul.f32 %v568_v6, %v568_v6  ;;  %v575_v8 = vld [vmem:[%s953_s1 + $0x8] sm:$0xff]  ;;  %v172_v15 = vmul.f32 %v580_v9, %v580_v9  ;;  %v598_v17 = vld [vmem:[%s952_s0 + $0x20] sm:$0xff]  ;;  %v174_v20 = vmul.f32 %v593_v16, %v593_v16  ;;  %v609_v22 = vld [vmem:[%s953_s1 + $0x18] sm:$0xff]  ;;  %vm408_vm8 = vcmask 589312  }
   0x4   :  { %v130_v10 = vsel %vm59_vm0, %v110_v3, 0.0  ;;  %v124_v11 = vsel %vm59_vm0, %v108_v4, 0.0  ;;  %v133_v12 = vsel %vm59_vm0, %v111_v5, 0.0  ;;  %v173_v14 = vmul.f32 %v575_v8, %v575_v8  ;;  %v614_v23 = vld [vmem:[%s952_s0 + $0x28] sm:$0xff]  ;;  %v625_v28 = vld [vmem:[%s953_s1 + $0x20] sm:$0xff]  ;;  %v630_v29 = vld [vmem:[%s952_s0 + $0x30] sm:$0xff] }
   0x5   :  { %131 = vadd.xlane.f32.xlu1 %v130_v10  ;;  %125 = vadd.xlane.f32.xlu0 %v124_v11  ;;  %v127_v13 = vsel %vm59_vm0, %v109_v7, 0.0  ;;  %v188_v19 = vsel %vm59_vm0, %v172_v15, 0.0  ;;  %v112_v21 = vmul.f32 %v598_v17, %v598_v17  ;;  %v194_v24 = vsel %vm59_vm0, %v174_v20, 0.0  ;;  %v42_v30 = vld [vmem:[%s953_s1 + $0x78] sm:$0xff]  ;;  %v644_v35 = vld [vmem:[%s953_s1 + $0x28] sm:$0xff]  ;;  %v663_v43 = vld [vmem:[%s953_s1 + $0x30] sm:$0xff] }
   0x6   :  { %v191_v18 = vsel %vm59_vm0, %v173_v14, 0.0  ;;  %v175_v26 = vmul.f32 %v609_v22, %v609_v22  ;;  %v113_v27 = vmul.f32 %v614_v23, %v614_v23  ;;  %v176_v33 = vmul.f32 %v625_v28, %v625_v28  ;;  %v649_v36 = vld [vmem:[%s952_s0 + $0x38] sm:$0xff]  ;;  %v668_v44 = vld [vmem:[%s952_s0 + $0x40] sm:$0xff]  ;;  %v693_v53 = vld [vmem:[%s952_s0 + $0x48] sm:$0xff] }
   0x7   :  { %v136_v25 = vsel %vm59_vm0, %v112_v21, 0.0  ;;  %v114_v34 = vmul.f32 %v630_v29, %v630_v29  ;;  %v187_v37 = vmul.f32 %v42_v30, %v42_v30  ;;  %v177_v41 = vmul.f32 %v644_v35, %v644_v35  ;;  %v673_v45 = vld [vmem:[%s952_s0 + $0x78] sm:$0xff]  ;;  %v704_v58 = vld [vmem:[%s953_s1 + $0x40] sm:$0xff]  ;;  %v709_v59 = vld [vmem:[%s952_s0 + $0x50] sm:$0xff] }
   0x8   :  { %v197_v31 = vsel %vm59_vm0, %v175_v26, 0.0  ;;  %v139_v32 = vsel %vm59_vm0, %v113_v27, 0.0  ;;  %v200_v39 = vsel %vm59_vm0, %v176_v33, 0.0  ;;  %v115_v42 = vmul.f32 %v649_v36, %v649_v36  ;;  %v688_v52 = vld [vmem:[%s953_s1 + $0x38] sm:$0xff]  ;;  %v720_v3 = vld [vmem:[%s953_s1 + $0x48] sm:$0xff] }
   0x9   :  { %134 = vadd.xlane.f32.xlu1 %v133_v12  ;;  %128 = vadd.xlane.f32.xlu0 %v127_v13  ;;  %v652_v38 = vsel %vm59_vm0, %v187_v37, 0.0  ;;  %v142_v40 = vsel %vm59_vm0, %v114_v34, 0.0  ;;  %v58_v46 = vmul.f32 %v42_v30, %v673_v45  ;;  %v178_v47 = vmul.f32 %v663_v43, %v663_v43  ;;  %v725_v4 = vld [vmem:[%s952_s0 + $0x58] sm:$0xff]  ;;  %v736_v12 = vld [vmem:[%s953_s1 + $0x50] sm:$0xff]  ;;  %v741_v13 = vld [vmem:[%s952_s0 + $0x60] sm:$0xff] }
   0xa   :  { %v203_v48 = vsel %vm59_vm0, %v177_v41, 0.0  ;;  %v145_v49 = vsel %vm59_vm0, %v115_v42, 0.0  ;;  %v116_v50 = vmul.f32 %v668_v44, %v668_v44  ;;  %v179_v56 = vmul.f32 %v688_v52, %v688_v52  ;;  %v38_v20 = vld [vmem:[%s953_s1 + $0x58] sm:$0xff]  ;;  %v755_v21 = vld [vmem:[%s952_s0 + $0x68] sm:$0xff]  ;;  %v39_v34 = vld [vmem:[%s953_s1 + $0x60] sm:$0xff] }
   0xb   :  { %v683_v51 = vsel %vm59_vm0, %v58_v46, 0.0  ;;  %v206_v54 = vsel %vm59_vm0, %v178_v47, 0.0  ;;  %v117_v57 = vmul.f32 %v693_v53, %v693_v53  ;;  %v180_v62 = vmul.f32 %v704_v58, %v704_v58  ;;  %v25_v37 = vld [vmem:[%s952_s0 + $0x70] sm:$0xff]  ;;  %v40_v46 = vld [vmem:[%s953_s1 + $0x68] sm:$0xff] }
   0xc   :  { %v148_v55 = vsel %vm59_vm0, %v116_v50, 0.0  ;;  %v209_v60 = vsel %vm59_vm0, %v179_v56, 0.0  ;;  %v118_v63 = vmul.f32 %v709_v59, %v709_v59  ;;  %v181_v10 = vmul.f32 %v720_v3, %v720_v3 }
   0xd   :  { %192 = vadd.xlane.f32.xlu1 %v191_v18  ;;  %189 = vadd.xlane.f32.xlu0 %v188_v19  ;;  %v151_v61 = vsel %vm59_vm0, %v117_v57, 0.0  ;;  %v212_v5 = vsel %vm59_vm0, %v180_v62, 0.0  ;;  %v119_v11 = vmul.f32 %v725_v4, %v725_v4  ;;  %v182_v18 = vmul.f32 %v736_v12, %v736_v12 }
   0xe   :  { %v154_v7 = vsel %vm59_vm0, %v118_v63, 0.0  ;;  %v215_v14 = vsel %vm59_vm0, %v181_v10, 0.0  ;;  %v120_v19 = vmul.f32 %v741_v13, %v741_v13  ;;  %v183_v26 = vmul.f32 %v38_v20, %v38_v20 }
   0xf   :  { %v157_v15 = vsel %vm59_vm0, %v119_v11, 0.0  ;;  %v121_v27 = vmul.f32 %v755_v21, %v755_v21  ;;  %v43_v33 = vmul.f32 %v580_v9, %v552_v1  ;;  %v184_v41 = vmul.f32 %v39_v34, %v39_v34 }
  0x10   :  { %v221_v30 = vsel %vm59_vm0, %v183_v26, 0.0  ;;  %v122_v42 = vmul.f32 %v25_v37, %v25_v37  ;;  %v45_v9 = vmul.f32 %v593_v16, %v547_v0  ;;  %v185_v50 = vmul.f32 %v40_v46, %v40_v46 }
  0x11   :  { %195 = vadd.xlane.f32.xlu1 %v194_v24  ;;  %137 = vadd.xlane.f32.xlu0 %v136_v25  ;;  %v218_v24 = vsel %vm59_vm0, %v182_v18, 0.0  ;;  %v160_v25 = vsel %vm59_vm0, %v120_v19, 0.0  ;;  %v224_v1 = vsel %vm59_vm0, %v184_v41, 0.0  ;;  %v56_v62 = vmul.f32 %v40_v46, %v755_v21 }
  0x12   :  { %v227_v16 = vsel %vm59_vm0, %v185_v50, 0.0  ;;  %vm415_vm9 = vcmask 654912   ;;  %vm422_vm10 = vcmask 720512   ;;  %vm429_vm11 = vcmask 786112  }
  0x13   :  { %vm436_vm12 = vcmask 851712   ;;  %vm443_vm13 = vcmask 917312   ;;  %vm450_vm14 = vcmask 982912   ;;  %vm457_vm15 = vcmask 1048512  }
  0x15   :  { %198 = vadd.xlane.f32.xlu1 %v197_v31  ;;  %140 = vadd.xlane.f32.xlu0 %v139_v32  ;;  %v163_v31 = vsel %vm59_vm0, %v121_v27, 0.0  ;;  %v44_v32 = vmul.f32 %v575_v8, %v568_v6  ;;  %v166_v6 = vsel %vm59_vm0, %v122_v42, 0.0  ;;  %v123_v8 = vmul.f32 %v673_v45, %v673_v45  ;;  %v41_v45 = vld [vmem:[%s953_s1 + $0x70] sm:$0xff] }
  0x17   :  { %v169_v47 = vsel %vm59_vm0, %v123_v8, 0.0 }
  0x19   :  { %201 = vadd.xlane.f32.xlu1 %v200_v39  ;;  %143 = vadd.xlane.f32.xlu0 %v142_v40  ;;  %v63_v39 = vsel %vm59_vm0, %v44_v32, 0.0  ;;  %v60_v40 = vsel %vm59_vm0, %v43_v33, 0.0 }
  0x1d   :  { %204 = vadd.xlane.f32.xlu1 %v203_v48  ;;  %146 = vadd.xlane.f32.xlu0 %v145_v49  ;;  %v66_v48 = vsel %vm59_vm0, %v45_v9, 0.0  ;;  %v46_v49 = vmul.f32 %v609_v22, %v557_v2  ;;  %v48_v22 = vmul.f32 %v644_v35, %v614_v23  ;;  %v52_v23 = vmul.f32 %v720_v3, %v693_v53 }
  0x1e   :  { %v51_v35 = vmul.f32 %v704_v58, %v668_v44  ;;  %v55_v44 = vmul.f32 %v39_v34, %v741_v13  ;;  %v99_v58 = vsel %vm59_vm0, %v56_v62, 0.0  ;;  %v57_v3 = vmul.f32 %v41_v45, %v25_v37 }
  0x1f   :  { %v69_v0 = vsel %vm59_vm0, %v46_v49, 0.0  ;;  %v75_v57 = vsel %vm59_vm0, %v48_v22, 0.0 }
  0x20   :  { %v96_v63 = vsel %vm59_vm0, %v55_v44, 0.0 }
  0x21   :  { %207 = vadd.xlane.f32.xlu1 %v206_v54  ;;  %149 = vadd.xlane.f32.xlu0 %v148_v55  ;;  %v47_v54 = vmul.f32 %v625_v28, %v598_v17  ;;  %v186_v55 = vmul.f32 %v41_v45, %v41_v45  ;;  %v49_v17 = vmul.f32 %v663_v43, %v630_v29 }
  0x22   :  { %v54_v29 = vmul.f32 %v38_v20, %v725_v4 }
  0x23   :  { %v72_v56 = vsel %vm59_vm0, %v47_v54, 0.0  ;;  %v230_v2 = vsel %vm59_vm0, %v186_v55, 0.0 }
  0x24   :  { %v93_v43 = vsel %vm59_vm0, %v54_v29, 0.0 }
  0x25   :  { %210 = vadd.xlane.f32.xlu1 %v209_v60  ;;  %152 = vadd.xlane.f32.xlu0 %v151_v61  ;;  %v50_v60 = vmul.f32 %v688_v52, %v649_v36  ;;  %v78_v61 = vsel %vm59_vm0, %v49_v17, 0.0  ;;  %v87_v36 = vsel %vm59_vm0, %v52_v23, 0.0  ;;  %v84_v52 = vsel %vm59_vm0, %v51_v35, 0.0 }
  0x27   :  { %v81_v28 = vsel %vm59_vm0, %v50_v60, 0.0 }
  0x29   :  { %213 = vadd.xlane.f32.xlu1 %v212_v5  ;;  %155 = vadd.xlane.f32.xlu0 %v154_v7 }
  0x2d   :  { %216 = vadd.xlane.f32.xlu1 %v215_v14  ;;  %158 = vadd.xlane.f32.xlu0 %v157_v15 }
  0x31   :  { %219 = vadd.xlane.f32.xlu1 %v218_v24  ;;  %161 = vadd.xlane.f32.xlu0 %v160_v25 }
  0x35   :  { %222 = vadd.xlane.f32.xlu1 %v221_v30  ;;  %164 = vadd.xlane.f32.xlu0 %v163_v31 }
  0x39   :  { %64 = vadd.xlane.f32.xlu1 %v63_v39  ;;  %61 = vadd.xlane.f32.xlu0 %v60_v40 }
  0x3d   :  { %225 = vadd.xlane.f32.xlu1 %v224_v1  ;;  %167 = vadd.xlane.f32.xlu0 %v166_v6  ;;  %v348_v1 = vlaneseq }
  0x3f   :  { %v858_v49 = vshrl.u32 %v348_v1, 7 }
  0x41   :  { %170 = vadd.xlane.f32.xlu1 %v169_v47  ;;  %67 = vadd.xlane.f32.xlu0 %v66_v48  ;;  %v856_v47 = vand.u32 127, %v348_v1 }
  0x43   :  { %v354_v50 = vadd.s32 4294967288, %v856_v47  ;;  %v352_v35 = vsub.s32 %v856_v47, %v858_v49 }
  0x45   :  { %70 = vadd.xlane.f32.xlu1 %v69_v0  ;;  %228 = vadd.xlane.f32.xlu0 %v227_v16  ;;  %v357_v60 = vsub.s32 %v354_v50, %v858_v49 }
  0x49   :  { %73 = vadd.xlane.f32.xlu1 %v72_v56  ;;  %231 = vadd.xlane.f32.xlu0 %v230_v2 }
  0x4d   :  { %76 = vadd.xlane.f32.xlu1 %v75_v57  ;;  %234 = vadd.xlane.f32.xlu0 %v652_v38  ;;  %v53_v38 = vmul.f32 %v736_v12, %v709_v59  ;;  %v102_v59 = vsel %vm59_vm0, %v57_v3, 0.0 }
  0x4f   :  { %v90_v53 = vsel %vm59_vm0, %v53_v38, 0.0 }
  0x51   :  { %82 = vadd.xlane.f32.xlu1 %v81_v28  ;;  %79 = vadd.xlane.f32.xlu0 %v78_v61 }
  0x55   :  { %88 = vadd.xlane.f32.xlu1 %v87_v36  ;;  %85 = vadd.xlane.f32.xlu0 %v84_v52  ;;  %v361_v36 = vadd.s32 4294967280, %v856_v47 }
  0x57   :  { %v364_v3 = vsub.s32 %v361_v36, %v858_v49 }
  0x59   :  { %94 = vadd.xlane.f32.xlu1 %v93_v43  ;;  %91 = vadd.xlane.f32.xlu0 %v90_v53 }
  0x5d   :  { %100 = vadd.xlane.f32.xlu1 %v99_v58  ;;  %97 = vadd.xlane.f32.xlu0 %v96_v63 }
  0x61   :  { %106 = vadd.xlane.f32.xlu1 %v683_v51  ;;  %103 = vadd.xlane.f32.xlu0 %v102_v59 }
  0x92   :  { %v132_v4 = vpop.xlane.xlu1 %131  ;;  %v126_v5 = vpop.xlane.xlu0 %125 }
  0x93   :  { %v236_v32 = vmax.f32 %v126_v5, 1e-24  ;;  %v238_v6 = vmax.f32 %v132_v4, 1e-24 }
  0x95   :  { %465 = vrsqrt.f32 %v236_v32 }
  0x96   :  { %v135_v7 = vpop.xlane.xlu1 %134  ;;  %v129_v10 = vpop.xlane.xlu0 %128 }
  0x97   :  { %v237_v33 = vmax.f32 %v129_v10, 1e-24  ;;  %v239_v54 = vmax.f32 %v135_v7, 1e-24 }
  0x99   :  { %467 = vrsqrt.f32 %v237_v33 }
  0x9a   :  { %v193_v11 = vpop.xlane.xlu1 %192  ;;  %v190_v12 = vpop.xlane.xlu0 %189 }
  0x9b   :  { %v269_v39 = vmax.f32 %v193_v11, 1e-24  ;;  %v268_v40 = vmax.f32 %v190_v12, 1e-24 }
  0x9d   :  { %469 = vrsqrt.f32 %v269_v39  ;;  %v896_v39 = vadd.s32 4294967240, %v856_v47 }
  0x9e   :  { %v196_v13 = vpop.xlane.xlu1 %195  ;;  %v138_v14 = vpop.xlane.xlu0 %137  ;;  %471 = vrsqrt.f32 %v268_v40 }
  0x9f   :  { %v270_v8 = vmax.f32 %v196_v13, 1e-24  ;;  %473 = vrsqrt.f32 %v238_v6  ;;  %v466_v48 = vpop.eup %465  ;;  %v240_v55 = vmax.f32 %v138_v14, 1e-24  ;;  %v880_v14 = vadd.s32 4294967272, %v856_v47 }
  0xa1   :  { %475 = vrsqrt.f32 %v270_v8  ;;  %v902_v8 = vadd.s32 4294967248, %v856_v47 }
  0xa2   :  { %v199_v15 = vpop.xlane.xlu1 %198  ;;  %v141_v18 = vpop.xlane.xlu0 %140  ;;  %477 = vrsqrt.f32 %v239_v54 }
  0xa3   :  { %v468_v16 = vpop.eup %467  ;;  %v271_v57 = vmax.f32 %v199_v15, 1e-24  ;;  %v241_v23 = vmax.f32 %v141_v18, 1e-24  ;;  %479 = vrsqrt.f32 %v240_v55  ;;  %v399_v55 = vsub.s32 %v896_v39, %v858_v49 }
  0xa5   :  { %481 = vrsqrt.f32 %v271_v57 }
  0xa6   :  { %v824_v19 = vpop.xlane.xlu1 %201  ;;  %v826_v20 = vpop.xlane.xlu0 %143  ;;  %483 = vrsqrt.f32 %v241_v23 }
  0xa7   :  { %v470_v22 = vpop.eup %469  ;;  %v272_v52 = vmax.f32 %v824_v19, 1e-24  ;;  %v242_v43 = vmax.f32 %v826_v20, 1e-24 }
  0xa8   :  { %v472_v61 = vpop.eup %471 }
  0xa9   :  { %v474_v53 = vpop.eup %473  ;;  %485 = vrsqrt.f32 %v272_v52 }
  0xaa   :  { %v828_v21 = vpop.xlane.xlu1 %204  ;;  %v830_v24 = vpop.xlane.xlu0 %146  ;;  %487 = vrsqrt.f32 %v242_v43 }
  0xab   :  { %v273_v62 = vmax.f32 %v828_v21, 1e-24  ;;  %v243_v63 = vmax.f32 %v830_v24, 1e-24  ;;  %v476_v4 = vpop.eup %475  ;;  %v886_v21 = vadd.s32 4294967264, %v856_v47 }
  0xad   :  { %489 = vrsqrt.f32 %v273_v62 }
  0xae   :  { %v832_v51 = vpop.xlane.xlu1 %207  ;;  %v834_v25 = vpop.xlane.xlu0 %149  ;;  %491 = vrsqrt.f32 %v243_v63 }
  0xaf   :  { %v274_v5 = vmax.f32 %v832_v51, 1e-24  ;;  %v244_v11 = vmax.f32 %v834_v25, 1e-24  ;;  %v890_v25 = vadd.s32 4294967256, %v856_v47 }
  0xb1   :  { %493 = vrsqrt.f32 %v274_v5 }
  0xb2   :  { %v836_v26 = vpop.xlane.xlu1 %210  ;;  %v838_v27 = vpop.xlane.xlu0 %152  ;;  %495 = vrsqrt.f32 %v244_v11 }
  0xb3   :  { %v275_v13 = vmax.f32 %v836_v26, 1e-24  ;;  %v245_v19 = vmax.f32 %v838_v27, 1e-24  ;;  %v478_v26 = vpop.eup %477 }
  0xb4   :  { %v480_v27 = vpop.eup %479 }
  0xb5   :  { %497 = vrsqrt.f32 %v275_v13 }
  0xb6   :  { %v840_v30 = vpop.xlane.xlu1 %213  ;;  %v842_v31 = vpop.xlane.xlu0 %155  ;;  %499 = vrsqrt.f32 %v245_v19 }
  0xb7   :  { %v276_v24 = vmax.f32 %v840_v30, 1e-24  ;;  %v246_v32 = vmax.f32 %v842_v31, 1e-24  ;;  %v371_v31 = vsub.s32 %v880_v14, %v858_v49 }
  0xb9   :  { %501 = vrsqrt.f32 %v276_v24 }
  0xba   :  { %v844_v34 = vpop.xlane.xlu1 %216  ;;  %v846_v37 = vpop.xlane.xlu0 %158  ;;  %503 = vrsqrt.f32 %v246_v32 }
  0xbb   :  { %v277_v40 = vmax.f32 %v844_v34, 1e-24  ;;  %v378_v34 = vsub.s32 %v886_v21, %v858_v49 }
  0xbd   :  { %505 = vrsqrt.f32 %v277_v40 }
  0xbe   :  { %v848_v41 = vpop.xlane.xlu1 %219  ;;  %v850_v42 = vpop.xlane.xlu0 %161 }
  0xc2   :  { %v852_v9 = vpop.xlane.xlu1 %222  ;;  %v854_v46 = vpop.xlane.xlu0 %164 }
  0xc6   :  { %v65_v45 = vpop.xlane.xlu1 %64  ;;  %v62_v0 = vpop.xlane.xlu0 %61 }
  0xc7   :  { %v301_v56 = vmul.f32 %v468_v16, %v65_v45  ;;  %v300_v2 = vmul.f32 %v466_v48, %v62_v0  ;;  %v247_v48 = vmax.f32 %v846_v37, 1e-24  ;;  %v482_v45 = vpop.eup %481  ;;  %v278_v0 = vmax.f32 %v848_v41, 1e-24 }
  0xc8   :  { %v385_v16 = vsub.s32 %v890_v25, %v858_v49  ;;  %v484_v54 = vpop.eup %483  ;;  %v248_v37 = vmax.f32 %v850_v42, 1e-24  ;;  %v279_v41 = vmax.f32 %v852_v9, 1e-24  ;;  %v249_v42 = vmax.f32 %v854_v46, 1e-24 }
  0xc9   :  { %v317_v29 = vmul.f32 %v470_v22, %v301_v56  ;;  %v316_v38 = vmul.f32 %v472_v61, %v300_v2  ;;  %v916_v56 = vadd.s32 4294967224, %v856_v47  ;;  %v486_v2 = vpop.eup %485  ;;  %v392_v61 = vsub.s32 %v902_v8, %v858_v49 }
  0xca   :  { %v862_v17 = vpop.xlane.xlu1 %225  ;;  %v864_v28 = vpop.xlane.xlu0 %167  ;;  %507 = vrsqrt.f32 %v247_v48  ;;  %v417_v25 = vadd.s32 4294967216, %v856_v47 }
  0xcb   :  { %v358_v7 = vrot.slane %v317_v29, %v357_v60  ;;  %v353_v10 = vrot.slane %v316_v38, %v352_v35  ;;  %v488_v23 = vpop.eup %487  ;;  %509 = vrsqrt.f32 %v278_v0  ;;  %v280_v29 = vmax.f32 %v862_v17, 1e-24 }
  0xcc   :  { %v490_v52 = vpop.eup %489  ;;  %v403_v38 = vadd.s32 4294967232, %v856_v47  ;;  %511 = vrsqrt.f32 %v248_v37  ;;  %v250_v43 = vmax.f32 %v864_v28, 1e-24  ;;  %v413_v62 = vsub.s32 %v916_v56, %v858_v49 }
  0xcd   :  { %v360_v51 = vsel %vm359_vm1, %v358_v7, %v353_v10  ;;  %v492_v9 = vpop.eup %491  ;;  %513 = vrsqrt.f32 %v279_v41 }
  0xce   :  { %v872_v44 = vpop.xlane.xlu1 %170  ;;  %v68_v58 = vpop.xlane.xlu0 %67  ;;  %515 = vrsqrt.f32 %v249_v42 }
  0xcf   :  { %v302_v59 = vmul.f32 %v474_v53, %v68_v58  ;;  %v494_v58 = vpop.eup %493  ;;  %517 = vrsqrt.f32 %v280_v29  ;;  %v251_v28 = vmax.f32 %v872_v44, 1e-24 }
  0xd0   :  { %v496_v17 = vpop.eup %495  ;;  %519 = vrsqrt.f32 %v250_v43 }
  0xd1   :  { %v318_v12 = vmul.f32 %v476_v4, %v302_v59  ;;  %v498_v10 = vpop.eup %497 }
  0xd2   :  { %v71_v15 = vpop.xlane.xlu1 %70  ;;  %v882_v18 = vpop.xlane.xlu0 %228 }
  0xd3   :  { %v365_v20 = vrot.slane %v318_v12, %v364_v3  ;;  %v303_v1 = vmul.f32 %v478_v26, %v71_v15  ;;  %v281_v63 = vmax.f32 %v882_v18, 1e-24  ;;  %v406_v12 = vsub.s32 %v403_v38, %v858_v49  ;;  %v500_v13 = vpop.eup %499 }
  0xd4   :  { %v502_v19 = vpop.eup %501 }
  0xd5   :  { %v893_v33 = vsel %vm366_vm2, %v365_v20, %v360_v51  ;;  %v319_v22 = vmul.f32 %v482_v45, %v303_v1  ;;  %521 = vrsqrt.f32 %v281_v63  ;;  %v504_v44 = vpop.eup %503 }
  0xd6   :  { %v74_v6 = vpop.xlane.xlu1 %73  ;;  %v899_v30 = vpop.xlane.xlu0 %231  ;;  %523 = vrsqrt.f32 %v251_v28 }
  0xd7   :  { %v304_v50 = vmul.f32 %v480_v27, %v74_v6  ;;  %v372_v46 = vrot.slane %v319_v22, %v371_v31  ;;  %v282_v14 = vmax.f32 %v899_v30, 1e-24  ;;  %v506_v40 = vpop.eup %505  ;;  %v424_v30 = vadd.s32 4294967208, %v856_v47 }
  0xd9   :  { %v320_v35 = vmul.f32 %v486_v2, %v304_v50  ;;  %v374_v20 = vsel %vm373_vm3, %v372_v46, %v893_v33  ;;  %v508_v33 = vpop.eup %507  ;;  %525 = vrsqrt.f32 %v282_v14  ;;  %v445_v46 = vadd.s32 4294967184, %v856_v47 }
  0xda   :  { %v77_v57 = vpop.xlane.xlu1 %76  ;;  %v235_v60 = vpop.xlane.xlu0 %234 }
  0xdb   :  { %v305_v36 = vmul.f32 %v484_v54, %v77_v57  ;;  %v379_v4 = vrot.slane %v320_v35, %v378_v34  ;;  %v283_v21 = vmax.f32 %v235_v60, 1e-24  ;;  %v510_v50 = vpop.eup %509  ;;  %v431_v34 = vadd.s32 4294967200, %v856_v47 }
  0xdc   :  { %v427_v57 = vsub.s32 %v424_v30, %v858_v49  ;;  %v438_v60 = vadd.s32 4294967192, %v856_v47 }
  0xdd   :  { %v321_v53 = vmul.f32 %v490_v52, %v305_v36  ;;  %v381_v26 = vsel %vm380_vm4, %v379_v4, %v374_v20  ;;  %527 = vrsqrt.f32 %v283_v21  ;;  %v434_v29 = vsub.s32 %v431_v34, %v858_v49 }
  0xde   :  { %v83_v3 = vpop.xlane.xlu1 %82  ;;  %v80_v59 = vpop.xlane.xlu0 %79 }
  0xdf   :  { %v307_v5 = vmul.f32 %v492_v9, %v83_v3  ;;  %v306_v7 = vmul.f32 %v488_v23, %v80_v59  ;;  %v386_v11 = vrot.slane %v321_v53, %v385_v16  ;;  %v512_v16 = vpop.eup %511  ;;  %v452_v9 = vadd.s32 4294967176, %v856_v47 }
  0xe0   :  { %v514_v2 = vpop.eup %513  ;;  %v448_v47 = vsub.s32 %v445_v46, %v858_v49 }
  0xe1   :  { %v323_v15 = vmul.f32 %v498_v10, %v307_v5  ;;  %v322_v18 = vmul.f32 %v494_v58, %v306_v7  ;;  %v388_v1 = vsel %vm387_vm5, %v386_v11, %v381_v26  ;;  %v455_v28 = vsub.s32 %v452_v9, %v858_v49 }
  0xe2   :  { %v89_v24 = vpop.xlane.xlu1 %88  ;;  %v86_v51 = vpop.xlane.xlu0 %85 }
  0xe3   :  { %v393_v32 = vrot.slane %v322_v18, %v392_v61  ;;  %v309_v39 = vmul.f32 %v500_v13, %v89_v24  ;;  %v308_v27 = vmul.f32 %v496_v17, %v86_v51  ;;  %v400_v6 = vrot.slane %v323_v15, %v399_v55  ;;  %v516_v61 = vpop.eup %515 }
  0xe4   :  { %v420_v55 = vsub.s32 %v417_v25, %v858_v49  ;;  %v518_v36 = vpop.eup %517  ;;  %v441_v17 = vsub.s32 %v438_v60, %v858_v49 }
  0xe5   :  { %v395_v8 = vsel %vm394_vm6, %v393_v32, %v388_v1  ;;  %v325_v48 = vmul.f32 %v506_v40, %v309_v39  ;;  %v324_v31 = vmul.f32 %v502_v19, %v308_v27  ;;  %v520_v43 = vpop.eup %519 }
  0xe6   :  { %v95_v45 = vpop.xlane.xlu1 %94  ;;  %v92_v0 = vpop.xlane.xlu0 %91  ;;  %v402_v22 = vsel %vm401_vm7, %v400_v6, %v395_v8 }
  0xe7   :  { %v407_v54 = vrot.slane %v324_v31, %v406_v12  ;;  %v311_v37 = vmul.f32 %v508_v33, %v95_v45  ;;  %v310_v56 = vmul.f32 %v504_v44, %v92_v0  ;;  %v414_v41 = vrot.slane %v325_v48, %v413_v62  ;;  %v522_v63 = vpop.eup %521 }
  0xe8   :  { %v524_v10 = vpop.eup %523 }
  0xe9   :  { %v409_v23 = vsel %vm408_vm8, %v407_v54, %v402_v22  ;;  %v327_v42 = vmul.f32 %v514_v2, %v311_v37  ;;  %v326_v35 = vmul.f32 %v510_v50, %v310_v56  ;;  %v526_v13 = vpop.eup %525 }
  0xea   :  { %v101_v52 = vpop.xlane.xlu1 %100  ;;  %v98_v38 = vpop.xlane.xlu0 %97  ;;  %v416_v59 = vsel %vm415_vm9, %v414_v41, %v409_v23 }
  0xeb   :  { %v421_v53 = vrot.slane %v326_v35, %v420_v55  ;;  %v313_v62 = vmul.f32 %v516_v61, %v101_v52  ;;  %v312_v58 = vmul.f32 %v512_v16, %v98_v38  ;;  %v428_v3 = vrot.slane %v327_v42, %v427_v57  ;;  %v528_v19 = vpop.eup %527 }
  0xed   :  { %v423_v4 = vsel %vm422_vm10, %v421_v53, %v416_v59  ;;  %v329_v5 = vmul.f32 %v522_v63, %v313_v62  ;;  %v328_v7 = vmul.f32 %v518_v36, %v312_v58 }
  0xee   :  { %v107_v11 = vpop.xlane.xlu1 %106  ;;  %v104_v12 = vpop.xlane.xlu0 %103  ;;  %v430_v21 = vsel %vm429_vm11, %v428_v3, %v423_v4 }
  0xef   :  { %v435_v14 = vrot.slane %v328_v7, %v434_v29  ;;  %v315_v15 = vmul.f32 %v524_v10, %v107_v11  ;;  %v314_v18 = vmul.f32 %v520_v43, %v104_v12  ;;  %v442_v20 = vrot.slane %v329_v5, %v441_v17 }
  0xf1   :  { %v437_v24 = vsel %vm436_vm12, %v435_v14, %v430_v21  ;;  %v331_v51 = vmul.f32 %v528_v19, %v315_v15  ;;  %v330_v25 = vmul.f32 %v526_v13, %v314_v18 }
  0xf2   :  { %v444_v32 = vsel %vm443_vm13, %v442_v20, %v437_v24 }
  0xf3   :  { %v456_v44 = vrot.slane %v331_v51, %v455_v28  ;;  %v449_v26 = vrot.slane %v330_v25, %v448_v47 }
  0xf5   :  { %v451_v39 = vsel %vm450_vm14, %v449_v26, %v444_v32 }
  0xf6   :  { %v458_v27 = vsel %vm457_vm15, %v456_v44, %v451_v39 }
  0xf7   :  { %460 = vst [vmem:[%s954_s2] sm:$0x1] %v458_v27 }

</bundles_post_ra>
